<compile_context>
chip_gen: v7x
topology: tpu7x:2x2x1
jax: 0.10.0
libtpu: 0.0.40
codegen_flags: <defaults>
</compile_context>

<pallas_src>
import functools

import jax
import jax.numpy as jnp
from jax.experimental import pallas as pl
from jax.experimental.pallas import tpu as pltpu

LANE = 128


def _round_up(x, m):
    return (x + m - 1) // m * m


def _actor_kernel(obs_ref, w1_ref, b1_ref, w2_ref, b2_ref, w3_ref, b3_ref, out_ref):
    x = obs_ref[...]                                   # [TB, obs_dim] f32

    # Layer 1: Linear + ReLU  (bf16 MXU operands, f32 accumulation)
    h1 = jnp.dot(x.astype(jnp.bfloat16), w1_ref[...],
                 preferred_element_type=jnp.float32) + b1_ref[...]
    h1 = jnp.maximum(h1, 0.0)

    # Layer 2: Linear + ReLU
    h2 = jnp.dot(h1.astype(jnp.bfloat16), w2_ref[...],
                 preferred_element_type=jnp.float32) + b2_ref[...]
    h2 = jnp.maximum(h2, 0.0)

    # Layer 3: Linear + Softmax(dim=-1), computed at the real action width.
    logits = jnp.dot(h2.astype(jnp.bfloat16), w3_ref[...],
                     preferred_element_type=jnp.float32) + b3_ref[...]
    m = jnp.max(logits, axis=-1, keepdims=True)
    e = jnp.exp(logits - m)
    denom = jnp.sum(e, axis=-1, keepdims=True)
    out_ref[...] = (e * pl.reciprocal(denom, approx=False)).astype(out_ref.dtype)


def prepare_actor_params(params):
    """One-time prep: pad hidden dims to 128 lanes and cast weights to bf16.

    Padded rows/cols are zero so they contribute nothing; biases stay f32.
    The action (output) dim is NOT padded — logits are computed at real width.
    """
    H = params["w1"].shape[1]
    HP = _round_up(H, LANE)
    return {
        "w1": jnp.pad(params["w1"], ((0, 0), (0, HP - H))).astype(jnp.bfloat16),
        "b1": jnp.pad(params["b1"], ((0, 0), (0, HP - H))),
        "w2": jnp.pad(params["w2"], ((0, HP - H), (0, HP - H))).astype(jnp.bfloat16),
        "b2": jnp.pad(params["b2"], ((0, 0), (0, HP - H))),
        "w3": jnp.pad(params["w3"], ((0, HP - H), (0, 0))).astype(jnp.bfloat16),
        "b3": params["b3"],
    }


@functools.partial(jax.jit, static_argnames=("tile_b",))
def actor_forward(obs, prepped, tile_b=2048):
    """obs: [B, obs_dim] f32.  prepped: output of prepare_actor_params()."""
    B, obs_dim = obs.shape
    action_dim = prepped["w3"].shape[1]

    # Batch tile: a multiple of 8 sublanes, or the full batch when it is small.
    if B <= tile_b:
        TB = B
    else:
        TB = _round_up(min(tile_b, B), 8)
    grid = (pl.cdiv(B, TB),)   # ragged last block handled by Pallas (no obs pad copy)

    def const_spec(shape):
        # Same block every grid step -> weights/biases stay resident in VMEM.
        return pl.BlockSpec(shape, lambda i: (0, 0), memory_space=pltpu.VMEM)

    # Scoped-VMEM budget: double-buffered obs + out tiles plus resident weights.
    weight_bytes = sum(int(v.size) * v.dtype.itemsize for v in prepped.values())
    tile_bytes = 2 * TB * obs_dim * 4 + 2 * TB * action_dim * 4
    vmem_bytes = int((tile_bytes + weight_bytes) * 1.25) + (1 << 20)   # headroom
    cp_kwargs = dict(dimension_semantics=("parallel",))
    if vmem_bytes > (16 << 20):              # above v5e's default scoped-VMEM limit
        cp_kwargs["vmem_limit_bytes"] = min(vmem_bytes, 64 << 20)   # v7x physical cap

    out = pl.pallas_call(
        _actor_kernel,
        out_shape=jax.ShapeDtypeStruct((B, action_dim), jnp.float32),
        grid=grid,
        in_specs=[
            pl.BlockSpec((TB, obs_dim), lambda i: (i, 0), memory_space=pltpu.VMEM),
            const_spec(prepped["w1"].shape), const_spec(prepped["b1"].shape),
            const_spec(prepped["w2"].shape), const_spec(prepped["b2"].shape),
            const_spec(prepped["w3"].shape), const_spec(prepped["b3"].shape),
        ],
        out_specs=pl.BlockSpec((TB, action_dim), lambda i: (i, 0),
                               memory_space=pltpu.VMEM),
        compiler_params=pltpu.CompilerParams(**cp_kwargs),
    )(obs, prepped["w1"], prepped["b1"], prepped["w2"], prepped["b2"],
      prepped["w3"], prepped["b3"])

    return out


def init_actor_params(key, obs_dim, action_dim, hidden=64):
    """Deterministic init mimicking PyTorch nn.Linear default (U[-1/sqrt(fan_in), 1/sqrt(fan_in)])."""
    keys = jax.random.split(key, 6)

    def linear(kw, kb, fan_in, fan_out):
        bound = 1.0 / jnp.sqrt(fan_in)
        w = jax.random.uniform(kw, (fan_in, fan_out), jnp.float32, -bound, bound)
        b = jax.random.uniform(kb, (1, fan_out), jnp.float32, -bound, bound)
        return w, b

    w1, b1 = linear(keys[0], keys[1], obs_dim, hidden)
    w2, b2 = linear(keys[2], keys[3], hidden, hidden)
    w3, b3 = linear(keys[4], keys[5], hidden, action_dim)
    return {"w1": w1, "b1": b1, "w2": w2, "b2": b2, "w3": w3, "b3": b3}


def _reference_bf16(obs, p):
    """Mirrors the kernel's bf16-operand / f32-accumulate arithmetic."""
    bf = jnp.bfloat16
    h1 = jnp.maximum(jnp.dot(obs.astype(bf), p["w1"].astype(bf),
                             preferred_element_type=jnp.float32) + p["b1"], 0.0)
    h2 = jnp.maximum(jnp.dot(h1.astype(bf), p["w2"].astype(bf),
                             preferred_element_type=jnp.float32) + p["b2"], 0.0)
    logits = jnp.dot(h2.astype(bf), p["w3"].astype(bf),
                     preferred_element_type=jnp.float32) + p["b3"]
    return jax.nn.softmax(logits, axis=-1)


def _reference_f32(obs, p):
    h1 = jnp.maximum(obs @ p["w1"] + p["b1"], 0.0)
    h2 = jnp.maximum(h1 @ p["w2"] + p["b2"], 0.0)
    logits = h2 @ p["w3"] + p["b3"]
    return jax.nn.softmax(logits, axis=-1)


if __name__ == "__main__":
    key = jax.random.PRNGKey(0)
    k_obs, k_params = jax.random.split(key)

    batch, obs_dim, action_dim = 24, 32, 8
    obs = jax.random.normal(k_obs, (batch, obs_dim), dtype=jnp.float32)
    params = init_actor_params(k_params, obs_dim, action_dim)
    prepped = prepare_actor_params(params)     # padded / bf16 weights prepared once

    ref_bf16 = _reference_bf16(obs, params)
    ref_f32 = _reference_f32(obs, params)

    # tile_b=8: evenly divided 3-step pipelined grid; tile_b=16: ragged last block
    # (24 % 16 != 0, exercised without padding obs); default tile_b: single full block.
    for tb in (8, 16, 2048):
        out = jax.block_until_ready(actor_forward(obs, prepped, tile_b=tb))
        assert out.shape == (batch, action_dim)
        # Matches the bf16-operand arithmetic the kernel performs.
        assert jnp.allclose(out, ref_bf16, atol=2e-3, rtol=2e-3)
        # Stays a faithful approximation of the original f32 module.
        assert jnp.allclose(out, ref_f32, atol=5e-2)
        # Valid probability distribution per row.
        assert jnp.allclose(jnp.sum(out, axis=-1), 1.0, atol=1e-5)

    print("KERNEL_OK")
</pallas_src>

<mosaic_0001>
module attributes {stable_mosaic.version = 11 : i64} {
  func.func @_actor_kernel(%arg0: i32, %arg1: memref<8x32xf32, #tpu.memory_space<vmem>>, %arg2: memref<32x128xbf16, #tpu.memory_space<vmem>>, %arg3: memref<1x128xf32, #tpu.memory_space<vmem>>, %arg4: memref<128x128xbf16, #tpu.memory_space<vmem>>, %arg5: memref<1x128xf32, #tpu.memory_space<vmem>>, %arg6: memref<128x8xbf16, #tpu.memory_space<vmem>>, %arg7: memref<1x8xf32, #tpu.memory_space<vmem>>, %arg8: memref<8x8xf32, #tpu.memory_space<vmem>>) attributes {dimension_semantics = [#tpu.dimension_semantics<parallel>], iteration_bounds = array<i64: 3>, scalar_prefetch = 0 : i64, scratch_operands = 0 : i64, tpu.core_type = #tpu.core_type<tc>, window_params = [{transform_indices = @transform_0, window_bounds = array<i64: 8, 32>}, {pipeline_mode = #tpu.pipeline_mode<synchronous>, transform_indices = @transform_1, window_bounds = array<i64: 32, 128>}, {pipeline_mode = #tpu.pipeline_mode<synchronous>, transform_indices = @transform_2, window_bounds = array<i64: 1, 128>}, {pipeline_mode = #tpu.pipeline_mode<synchronous>, transform_indices = @transform_3, window_bounds = array<i64: 128, 128>}, {pipeline_mode = #tpu.pipeline_mode<synchronous>, transform_indices = @transform_4, window_bounds = array<i64: 1, 128>}, {pipeline_mode = #tpu.pipeline_mode<synchronous>, transform_indices = @transform_5, window_bounds = array<i64: 128, 8>}, {pipeline_mode = #tpu.pipeline_mode<synchronous>, transform_indices = @transform_6, window_bounds = array<i64: 1, 8>}, {transform_indices = @transform_7, window_bounds = array<i64: 8, 8>}]} {
    %c0 = arith.constant 0 : index
    %c0_0 = arith.constant 0 : index
    %0 = vector.load %arg1[%c0, %c0_0] : memref<8x32xf32, #tpu.memory_space<vmem>>, vector<8x32xf32>
    %1 = arith.truncf %0 : vector<8x32xf32> to vector<8x32xbf16>
    %c0_1 = arith.constant 0 : index
    %c0_2 = arith.constant 0 : index
    %2 = vector.load %arg2[%c0_1, %c0_2] : memref<32x128xbf16, #tpu.memory_space<vmem>>, vector<32x128xbf16>
    %cst = arith.constant dense<0.000000e+00> : vector<8x128xf32>
    %3 = tpu.matmul %1, %2, %cst {dimension_numbers = #tpu.dot_dimension_numbers<[1], [0], [0], [1], [0, 0, 1, 1], [], []>} : vector<8x32xbf16>, vector<32x128xbf16>, vector<8x128xf32> -> vector<8x128xf32>
    %c0_3 = arith.constant 0 : index
    %c0_4 = arith.constant 0 : index
    %4 = vector.load %arg3[%c0_3, %c0_4] : memref<1x128xf32, #tpu.memory_space<vmem>>, vector<1x128xf32>
    %5 = vector.broadcast %4 : vector<1x128xf32> to vector<8x128xf32>
    %6 = arith.addf %3, %5 : vector<8x128xf32>
    %cst_5 = arith.constant 0.000000e+00 : f32
    %7 = vector.broadcast %cst_5 : f32 to vector<8x128xf32>
    %8 = arith.maximumf %6, %7 : vector<8x128xf32>
    %9 = arith.truncf %8 : vector<8x128xf32> to vector<8x128xbf16>
    %c0_6 = arith.constant 0 : index
    %c0_7 = arith.constant 0 : index
    %10 = vector.load %arg4[%c0_6, %c0_7] : memref<128x128xbf16, #tpu.memory_space<vmem>>, vector<128x128xbf16>
    %cst_8 = arith.constant dense<0.000000e+00> : vector<8x128xf32>
    %11 = tpu.matmul %9, %10, %cst_8 {dimension_numbers = #tpu.dot_dimension_numbers<[1], [0], [0], [1], [0, 0, 1, 1], [], []>} : vector<8x128xbf16>, vector<128x128xbf16>, vector<8x128xf32> -> vector<8x128xf32>
    %c0_9 = arith.constant 0 : index
    %c0_10 = arith.constant 0 : index
    %12 = vector.load %arg5[%c0_9, %c0_10] : memref<1x128xf32, #tpu.memory_space<vmem>>, vector<1x128xf32>
    %13 = vector.broadcast %12 : vector<1x128xf32> to vector<8x128xf32>
    %14 = arith.addf %11, %13 : vector<8x128xf32>
    %cst_11 = arith.constant 0.000000e+00 : f32
    %15 = vector.broadcast %cst_11 : f32 to vector<8x128xf32>
    %16 = arith.maximumf %14, %15 : vector<8x128xf32>
    %17 = arith.truncf %16 : vector<8x128xf32> to vector<8x128xbf16>
    %c0_12 = arith.constant 0 : index
    %c0_13 = arith.constant 0 : index
    %18 = vector.load %arg6[%c0_12, %c0_13] : memref<128x8xbf16, #tpu.memory_space<vmem>>, vector<128x8xbf16>
    %cst_14 = arith.constant dense<0.000000e+00> : vector<8x8xf32>
    %19 = tpu.matmul %17, %18, %cst_14 {dimension_numbers = #tpu.dot_dimension_numbers<[1], [0], [0], [1], [0, 0, 1, 1], [], []>} : vector<8x128xbf16>, vector<128x8xbf16>, vector<8x8xf32> -> vector<8x8xf32>
    %c0_15 = arith.constant 0 : index
    %c0_16 = arith.constant 0 : index
    %20 = vector.load %arg7[%c0_15, %c0_16] : memref<1x8xf32, #tpu.memory_space<vmem>>, vector<1x8xf32>
    %21 = vector.broadcast %20 : vector<1x8xf32> to vector<8x8xf32>
    %22 = arith.addf %19, %21 : vector<8x8xf32>
    %cst_17 = arith.constant dense<0xFF800000> : vector<8xf32>
    %23 = vector.multi_reduction <maximumf>, %22, %cst_17 [1] : vector<8x8xf32> to vector<8xf32>
    %24 = vector.shape_cast %23 : vector<8xf32> to vector<8x1xf32>
    %25 = vector.broadcast %24 : vector<8x1xf32> to vector<8x8xf32>
    %26 = arith.subf %22, %25 : vector<8x8xf32>
    %27 = math.exp %26 : vector<8x8xf32>
    %cst_18 = arith.constant dense<0.000000e+00> : vector<8xf32>
    %28 = vector.multi_reduction <add>, %27, %cst_18 [1] : vector<8x8xf32> to vector<8xf32>
    %29 = vector.shape_cast %28 : vector<8xf32> to vector<8x1xf32>
    %30 = tpu.reciprocal %29 : vector<8x1xf32> -> vector<8x1xf32>
    %31 = vector.broadcast %30 : vector<8x1xf32> to vector<8x8xf32>
    %32 = arith.mulf %27, %31 : vector<8x8xf32>
    %c0_19 = arith.constant 0 : index
    %c0_20 = arith.constant 0 : index
    %33 = vector.load %arg8[%c0_19, %c0_20] : memref<8x8xf32, #tpu.memory_space<vmem>>, vector<8x8xf32>
    tpu.vector_store %arg8[%c0_19, %c0_20], %32 {strides = array<i32>} : memref<8x8xf32, #tpu.memory_space<vmem>>, vector<8x8xf32>,
    return
  }
  func.func @transform_0(%arg0: i32) -> (i32, i32) {
    %c0_i32 = arith.constant 0 : i32
    %c0_i32_0 = arith.constant 0 : i32
    return %arg0, %c0_i32 : i32, i32
  }
  func.func @transform_1(%arg0: i32) -> (i32, i32) {
    %c0_i32 = arith.constant 0 : i32
    %c0_i32_0 = arith.constant 0 : i32
    %c0_i32_1 = arith.constant 0 : i32
    return %c0_i32, %c0_i32_0 : i32, i32
  }
  func.func @transform_2(%arg0: i32) -> (i32, i32) {
    %c0_i32 = arith.constant 0 : i32
    %c0_i32_0 = arith.constant 0 : i32
    %c0_i32_1 = arith.constant 0 : i32
    return %c0_i32, %c0_i32_0 : i32, i32
  }
  func.func @transform_3(%arg0: i32) -> (i32, i32) {
    %c0_i32 = arith.constant 0 : i32
    %c0_i32_0 = arith.constant 0 : i32
    %c0_i32_1 = arith.constant 0 : i32
    return %c0_i32, %c0_i32_0 : i32, i32
  }
  func.func @transform_4(%arg0: i32) -> (i32, i32) {
    %c0_i32 = arith.constant 0 : i32
    %c0_i32_0 = arith.constant 0 : i32
    %c0_i32_1 = arith.constant 0 : i32
    return %c0_i32, %c0_i32_0 : i32, i32
  }
  func.func @transform_5(%arg0: i32) -> (i32, i32) {
    %c0_i32 = arith.constant 0 : i32
    %c0_i32_0 = arith.constant 0 : i32
    %c0_i32_1 = arith.constant 0 : i32
    return %c0_i32, %c0_i32_0 : i32, i32
  }
  func.func @transform_6(%arg0: i32) -> (i32, i32) {
    %c0_i32 = arith.constant 0 : i32
    %c0_i32_0 = arith.constant 0 : i32
    %c0_i32_1 = arith.constant 0 : i32
    return %c0_i32, %c0_i32_0 : i32, i32
  }
  func.func @transform_7(%arg0: i32) -> (i32, i32) {
    %c0_i32 = arith.constant 0 : i32
    %c0_i32_0 = arith.constant 0 : i32
    return %arg0, %c0_i32 : i32, i32
  }
}

</mosaic_0001>

<bundles_post_ra>
// kernel: actor_forward.1
= control target key start
LH: loop header
LB: loop body
LE: loop exit
PB: predicated region body
PF: predicated region fallthrough
CT: control target
= control target key end

     0   :  { %12 = vsyncpa [#allocation3], 0  ;;  %s1138_s0 = inlined_call_operand.hbm [shape: f32[24,32], index: 0, kind: input, shape index: {}]   ;;  %s1139_s1 = inlined_call_operand.vmem [shape: bf16[32,128], index: 1, kind: input, shape index: {}]   ;;  %s1140_s2 = inlined_call_operand.vmem [shape: f32[1,128], index: 2, kind: input, shape index: {}]   ;;  %s1141_s3 = inlined_call_operand.vmem [shape: bf16[128,128], index: 3, kind: input, shape index: {}]   ;;  %s1142_s4 = inlined_call_operand.vmem [shape: f32[1,128], index: 4, kind: input, shape index: {}]   ;;  %s1143_s5 = inlined_call_operand.vmem [shape: bf16[128,8], index: 5, kind: input, shape index: {}]   ;;  %s1144_s6 = inlined_call_operand.vmem [shape: f32[1,8], index: 6, kind: input, shape index: {}]   ;;  %s1145_s7 = inlined_call_operand.vmem [shape: f32[24,8], index: 7, kind: output, shape index: {}]  }
   0x1   :  { %14 = vsyncpa [#allocation3 + $0x1], 0  ;;  %s941_s24 = smov 0   ;;  %s943_s25 = smov 0  }
   0x2   :  { %s945_s26 = smov 0   ;;  %s947_s27 = smov 0  }
   0x3 LB: > { %s960_s28 = sadd.s32 4294967295, %s896_s27   ;;  %s963_s29 = sadd.s32 1, %s896_s27   ;;  %s896_s27 = sphi %s947_s27, %s1153_s27   ;;  %s892_s26 = sphi %s945_s26, %s1152_s26   ;;  %s888_s25 = sphi %s943_s25, %s1151_s25   ;;  %s884_s24 = sphi %s941_s24, %s1150_s24  }
   0x4   : > { %s24_s30 = ssub.s32 %s896_s27, %s963_s29  ;;  %s27_s8 = sadd.s32 1, %s892_s26 }
   0x5   : > { %p25_p0 = scmp.eq.s32.totalorder %s24_s30, 0  ;;  %p34_p1 = scmp.ne.s32.totalorder %s892_s26, %s888_s25 }
   0x6   : > { %p35_p2 = scmp.eq.s32.totalorder %s896_s27, 0  ;;  %p40_p3 = scmp.ne.s32.totalorder %s888_s25, %s884_s24 }
   0x7   : > { %s973_s9 = scalar_select %p25_p0, %s892_s26, %s27_s8  }
   0x8   : > { %p36_p4 = por %p35_p2, %p34_p1  ;;  %p41_p5 = scmp.eq.s32.totalorder %s960_s28, 0 }
   0x9   : > { %p775_p6 = scmp.lt.s32.totalorder %s896_s27, 3  ;;  %s234_s11 = sand.u32 1, %s892_s26  }
   0xa   : > { %p977_p7 = por %p41_p5, %p40_p3  ;;  %s671_s12 = sshll.u32 %s234_s11, 3 }
   0xb   : > { %s672_s13 = sshll.u32 %s896_s27, 7  ;;  %s238_s17 = scalar_lea.vmem [#allocation2], %s671_s12 }
   0xc   : > { %s986_s16 = scalar_lea.hbm %s1138_s0, %s672_s13  ;;  %s245_s18 = sshll.u32 %s238_s17, 4  ;;  %s988_s18 = int_to_ptr.vmem [resolvable:$true] %s245_s18 }
   0xd   : > { %p990_p8 = pnand %p775_p6, %p36_p4  ;;  %s235_s20 = scalar_lea.sflag [#allocation3], %s234_s11 }
   0xe   : > { %s832_s21 = scalar_lea.hbm %s986_s16, 128  ;;  %s837_s24 = scalar_lea.hbm %s1138_s0, 384 }
   0xf   : > { %p833_p11 = scmp.ne.s32.totalorder %s986_s16, %s832_s21  ;;  %p834_p12 = pneg %p990_p8 }
  0x10   : > { %p838_p1 = scmp.lt.u32.totalorder %s986_s16, %s1138_s0  ;;  %p839_p2 = scmp.lt.u32.totalorder %s837_s24, %s832_s21 }
  0x11   : > { %p835_p13 = pnand %p834_p12, %p833_p11  ;;  %p841_p4 = scmp.lt.u32.totalorder %s832_s21, %s986_s16 }
  0x12   : > { %p840_p3 = por %p839_p2, %p838_p1 }
  0x13   : > { %p836_p0 = pneg %p835_p13 }
  0x14   : > { %p842_p5 = por %p841_p4, %p840_p3 }
  0x16   : > { %p843_p6 = pnand %p842_p5, %p836_p0 }
  0x18   : > { %846 = shalt.err (!%p843_p6)
}
  0x19   : > { %s847_s11 = scalar_lea.vmem %s988_s18, 128  ;;  %s898_s12 = smov [#allocation2]  }
  0x1a   : > { %p848_p11 = scmp.ne.s32.totalorder %s988_s18, %s847_s11  ;;  %s852_s13 = sshll.u32 %s898_s12, 4  ;;  %s853_s13 = int_to_ptr.vmem [resolvable:$false] %s852_s13 }
  0x1b   : > { %s854_s14 = scalar_lea.vmem %s853_s13, 256  ;;  %p855_p10 = scmp.lt.s32.totalorder %s988_s18, %s853_s13 }
  0x1c   : > { %p850_p13 = pnand %p848_p11, %p834_p12  ;;  %p856_p1 = scmp.lt.s32.totalorder %s854_s14, %s847_s11 }
  0x1e   : > { %p851_p9 = pneg %p850_p13  ;;  %p857_p2 = por %p856_p1, %p855_p10 }
  0x20   : > { %p858_p3 = pnand %p857_p2, %p851_p9 }
  0x22   : > { %861 = shalt.err (!%p858_p3)
}
  0x23   : > { %774 = dma.hbm_to_vmem [thread:$0]  (!%p990_p8), %s986_s16, 128, %s988_s18, %s235_s20  }
  0x24   : > { %p1148_p0 = scmp.lt.s32.totalorder %s896_s27, 4  ;;  %p1149_p4 = scmp.ge.s32.totalorder %s896_s27, 1 }
  0x26   : > { %p251_p12 = pnand %p1149_p4, %p1148_p0 }
  0x27   : > { %s256_s15 = sand.u32 (!%p251_p12), 1, %s888_s25  }
  0x28   : > { %254 = sbr.rel (%p251_p12) target bundleno = 1023 (0x3ff), region = 48  ;;  %s674_s17 = sshll.u32 (!%p251_p12), %s256_s15, 3 }
  0x29   : > { %s257_s21 = scalar_lea.sflag (!%p251_p12), [#allocation3], %s256_s15  ;;  %s260_s22 = scalar_lea.vmem (!%p251_p12), [#allocation2], %s674_s17 }
  0x2f   : > { %879 = dma.done.wait (%p977_p7), %s257_s21, 128  }
  0x30   : > { %881 = vsyncadd (%p977_p7), %s257_s21, 4294967168  ;;  %v899_v0 = vmov 0.0   ;;  %vm900_vm0 = vmmov 0   ;;  %v810_v1 = vld [vmem:[%s1139_s1] sm:$0xff]   ;;  %v811_v2 = vld [vmem:[%s1139_s1 + $0x8] sm:$0xff]   ;;  %vm320_vm1 = vcmask 261120  }
  0x31   : > { %721 = vmatprep.subr.bf16.mxu0 %v899_v0  ;;  %725 = vmatprep.mubr.msk.bf16.mxu0 %vm900_vm0, %v899_v0  ;;  %v295_v3 = vld [vmem:[%s260_s22] sm:$0xff]  ;;  %v814_v7 = vld [vmem:[%s1141_s3 + $0x10] sm:$0xff]   ;;  %v815_v8 = vld [vmem:[%s1141_s3 + $0x18] sm:$0xff]   ;;  %vm590_vm2 = vcmask 64512   ;;  %p290_p7 = scmp.lt.s32.totalorder %s960_s28, 2 }
  0x32   : > { %729 = vmatprep.subr.bf16.mxu1 %v899_v0  ;;  %745 = vmatprep.mubr.msk.bf16.mxu1 %vm900_vm0, %v899_v0  ;;  %v812_v4 = vld [vmem:[%s1141_s3] sm:$0xff]   ;;  %v296_v5 = vpack.c.bf16 %v295_v3, %v295_v3  ;;  %v813_v6 = vld [vmem:[%s1141_s3 + $0x8] sm:$0xff]   ;;  %v818_v11 = vld [vmem:[%s1141_s3 + $0x30] sm:$0xff]  }
  0x33   : > { %722 = vmatpush3.bf16.msra.mxu0 %v810_v1  ;;  %730 = vmatpush3.bf16.msra.mxu1 %v812_v4  ;;  %v816_v9 = vld [vmem:[%s1141_s3 + $0x20] sm:$0xff]   ;;  %v817_v10 = vld [vmem:[%s1141_s3 + $0x28] sm:$0xff]   ;;  %v819_v12 = vld [vmem:[%s1141_s3 + $0x38] sm:$0xff]   ;;  %s1155_s28 = smov (!%p290_p7, %s960_s28), 2 }
  0x34   : > { %723 = vmatprep.subr.bf16.mxu0 %v899_v0  ;;  %731 = vmatprep.subr.bf16.mxu1 %v899_v0  ;;  %v820_v13 = vld [vmem:[%s1143_s5] sm:$0xff]   ;;  %v821_v14 = vld [vmem:[%s1143_s5 + $0x8] sm:$0xff]   ;;  %v822_v15 = vld [vmem:[%s1143_s5 + $0x10] sm:$0xff]   ;;  %s675_s23 = sshll.u32 %s1155_s28, 3 }
  0x35   : > { %v823_v16 = vld [vmem:[%s1143_s5 + $0x18] sm:$0xff]   ;;  %v824_v17 = vld [vmem:[%s1143_s5 + $0x20] sm:$0xff]   ;;  %v825_v18 = vld [vmem:[%s1143_s5 + $0x28] sm:$0xff]   ;;  %s293_s8 = scalar_lea.vmem %s1145_s7, %s675_s23 }
  0x36   : > { %v676_v19 = vld [vmem:[%s1140_s2] ss:$0 sm:$0xff]  ;;  %v826_v27 = vld [vmem:[%s1143_s5 + $0x30] sm:$0xff]   ;;  %v827_v28 = vld [vmem:[%s1143_s5 + $0x38] sm:$0xff]  }
  0x37   : > { %724 = vmatpush3.bf16.msra.mxu0 %v811_v2  ;;  %732 = vmatpush3.bf16.msra.mxu1 %v813_v6  ;;  %v680_v29 = vld [vmem:[%s1142_s4] ss:$0 sm:$0xff] }
  0x38   : > { %749 = vmatprep.subr.bf16.mxu0 %v899_v0  ;;  %733 = vmatprep.subr.bf16.mxu1 %v899_v0  ;;  %v689_v37 = vld [vmem:[%s1144_s6] ss:$0 sm:$0xff] }
  0x3a   : > { %726 = vmatmul.mubr.msk.bf16.vlgmr.msra.gmra.mrb[0].mxu0 %vm320_vm1, %v296_v5 }
  0x3b   : > { %765 = vmatprep.mubr.msk.bf16.mxu0 %vm900_vm0, %v899_v0  ;;  %734 = vmatpush3.bf16.msra.mxu1 %v814_v7 }
  0x3c   : > { %735 = vmatprep.subr.bf16.mxu1 %v899_v0  ;;  %750 = vmatpush3.bf16.msra.mxu0 %v820_v13 }
  0x3d   : > { %751 = vmatprep.subr.bf16.mxu0 %v899_v0 }
  0x3f   : > { %736 = vmatpush3.bf16.msra.mxu1 %v815_v8 }
  0x40   : > { %737 = vmatprep.subr.bf16.mxu1 %v899_v0  ;;  %752 = vmatpush3.bf16.msra.mxu0 %v821_v14 }
  0x41   : > { %753 = vmatprep.subr.bf16.mxu0 %v899_v0 }
  0x43   : > { %738 = vmatpush3.bf16.msra.mxu1 %v816_v9 }
  0x44   : > { %739 = vmatprep.subr.bf16.mxu1 %v899_v0  ;;  %754 = vmatpush3.bf16.msra.mxu0 %v822_v15 }
  0x45   : > { %755 = vmatprep.subr.bf16.mxu0 %v899_v0 }
  0x47   : > { %740 = vmatpush3.bf16.msra.mxu1 %v817_v10 }
  0x48   : > { %741 = vmatprep.subr.bf16.mxu1 %v899_v0  ;;  %756 = vmatpush3.bf16.msra.mxu0 %v823_v16 }
  0x49   : > { %757 = vmatprep.subr.bf16.mxu0 %v899_v0 }
  0x4b   : > { %742 = vmatpush3.bf16.msra.mxu1 %v818_v11 }
  0x4c   : > { %743 = vmatprep.subr.bf16.mxu1 %v899_v0  ;;  %758 = vmatpush3.bf16.msra.mxu0 %v824_v17 }
  0x4d   : > { %759 = vmatprep.subr.bf16.mxu0 %v899_v0 }
  0x4f   : > { %744 = vmatpush3.bf16.msra.mxu1 %v819_v12 }
  0x50   : > { %760 = vmatpush3.bf16.msra.mxu0 %v825_v18 }
  0x51   : > { %761 = vmatprep.subr.bf16.mxu0 %v899_v0 }
  0x54   : > { %762 = vmatpush3.bf16.msra.mxu0 %v826_v27 }
  0x55   : > { %763 = vmatprep.subr.bf16.mxu0 %v899_v0 }
  0x58   : > { %764 = vmatpush3.bf16.msra.mxu0 %v827_v28 }
 0x10d   : > { %v358_v20 = vpop.f32.mrb[0].mxu0 }
 0x10e   : > { %v359_v21 = vadd.f32 %v676_v19, %v358_v20  ;;  %v727_v22 = vpop.f32.mrb[1].mxu0 }
 0x10f   : > { %v361_v23 = vpop.f32.mrb[2].mxu0 }
 0x110   : > { %v364_v24 = vmax.f32 %v359_v21, 0.0  ;;  %v728_v25 = vpop.f32.mrb[3].mxu0 }
 0x112   : > { %v365_v26 = vpack.c.bf16 %v364_v24, %v364_v24 }
 0x114   : > { %746 = vmatmul.mubr.bf16.vlgmr.msra.gmra.mrb[0].mxu1 %v365_v26 }
 0x1e7   : > { %v471_v30 = vpop.f32.mrb[0].mxu1 }
 0x1e8   : > { %v472_v31 = vadd.f32 %v680_v29, %v471_v30  ;;  %v747_v32 = vpop.f32.mrb[1].mxu1 }
 0x1e9   : > { %v474_v33 = vpop.f32.mrb[2].mxu1 }
 0x1ea   : > { %v477_v34 = vmax.f32 %v472_v31, 0.0  ;;  %v748_v35 = vpop.f32.mrb[3].mxu1 }
 0x1ec   : > { %v478_v36 = vpack.c.bf16 %v477_v34, %v477_v34 }
 0x1ee   : > { %766 = vmatmul.mubr.bf16.vlgmr.msra.gmra.mrb[4].mxu0 %v478_v36 }
 0x2c1   : > { %v584_v38 = vpop.f32.mrb[4].mxu0 }
 0x2c2   : > { %v585_v39 = vadd.f32 %v689_v37, %v584_v38  ;;  %v767_v40 = vpop.f32.mrb[5].mxu0 }
 0x2c3   : > { %v587_v41 = vpop.f32.mrb[6].mxu0 }
 0x2c4   : > { %v768_v42 = vpop.f32.mrb[7].mxu0  ;;  %v591_v43 = vsel %vm590_vm2, %v585_v39, -inf }
 0x2c5   : > { %592 = vmax.xlane.f32.xlu0 %v591_v43 }
 0x352   : > { %v593_v44 = vpop.xlane.xlu0 %592 }
 0x353   : > { %v594_v45 = vsub.f32 %v585_v39, %v593_v44 }
 0x355   : > { %v595_v46 = vmul.f32 1.442695, %v594_v45 }
 0x357   : > { %828 = vpow2.f32 %v595_v46 }
 0x361   : > { %v829_v47 = vpop.eup %828 }
 0x362   : > { %v597_v48 = vsel %vm590_vm2, %v829_v47, 0.0 }
 0x363   : > { %598 = vadd.xlane.f32.xlu0 %v597_v48 }
 0x3f0   : > { %v599_v49 = vpop.xlane.xlu0 %598 }
 0x3f1   : > { %830 = vrcp.f32 %v599_v49 }
 0x3fb   : > { %v831_v50 = vpop.eup %830 }
 0x3fc   : > { %v601_v51 = vmul.f32 %v831_v50, %v829_v47 }
 0x3fe   : > { %602 = vst.msk [vmem:[%s293_s8] sm:$0xff] %vm590_vm2, %v601_v51 }
 0x3ff PF: > { %p17_p8 = scmp.ge.s32.totalorder %s963_s29, 5   ;;  %s1150_s24 = smov %s888_s25 }
 0x400   : > { %s1151_s25 = smov %s892_s26  ;;  %s1152_s26 = smov %s973_s9 }
 0x401   : > { %s1153_s27 = smov %s963_s29  ;;  %19 = sbr.rel (!%p17_p8) target bundleno = 3 (0x3), region = 88 }
 0x408   :  { %622 = vsyncpa [#allocation3], 1 }
 0x409   :  { %624 = vsyncpa [#allocation3 + $0x1], 1 }

</bundles_post_ra>
